<compile_context>
chip_gen: v7x
topology: tpu7x:2x2x1
jax: 0.10.0
libtpu: 0.0.40
codegen_flags: <defaults>
</compile_context>

<pallas_src>
import functools
import math

import numpy as np
import jax
import jax.numpy as jnp
from jax.experimental import pallas as pl
from jax.experimental.pallas import tpu as pltpu


NEG_BIG = -1e30  # effectively -inf for the block-diagonal softmax mask


def atten_kernel(q_ref, k_ref, v_ref, mask_ref,
                 wq_ref, bq_ref, wk_ref, bk_ref, wo_ref, bo_ref,
                 o_ref, *, bt, nq, nk, group, mxu_dtype):
    """One grid step processes a tile of `bt` batch elements.

    q_ref    : (bt*nq, D)              flattened query rows of this batch tile
    k_ref    : (bt*nk, D)              flattened key rows
    v_ref    : (bt*nk, D)              flattened value rows
    mask_ref : (group*nq, group*nk)    block-diagonal additive mask (0 / -1e30)
    wq/wk/wo : (D, D)                  weights (wq pre-scaled by 1/sqrt(D))
    bq/bk/bo : (1, D)                  f32 biases (bq pre-scaled by 1/sqrt(D))
    o_ref    : (bt*nq, D)
    """
    D = q_ref.shape[-1]

    # ---- input projections: flattened-M MXU passes, f32 accumulation -------
    # K and V use the same (resident 32x32) weight; two dots, no concat copies.
    qp = jnp.dot(q_ref[...].astype(mxu_dtype), wq_ref[...],
                 preferred_element_type=jnp.float32) + bq_ref[...]
    kp = jnp.dot(k_ref[...].astype(mxu_dtype), wk_ref[...],
                 preferred_element_type=jnp.float32) + bk_ref[...]
    vp = jnp.dot(v_ref[...].astype(mxu_dtype), wk_ref[...],
                 preferred_element_type=jnp.float32) + bk_ref[...]

    # ---- cross-batch grouped attention --------------------------------------
    # `group` batch elements share one dense (group*nq, group*nk) score matrix
    # per MXU pass; off-diagonal (nq x nk) blocks get -1e30 so they are exactly
    # 0 after softmax and do not pollute the attn @ V matmul.  group*nq and
    # group*nk are multiples of 8, so these reshapes are free sublane relabels.
    ng = bt // group
    gq = group * nq
    gk = group * nk
    qp3 = qp.reshape(ng, gq, D).astype(mxu_dtype)
    kp3 = kp.reshape(ng, gk, D).astype(mxu_dtype)
    vp3 = vp.reshape(ng, gk, D).astype(mxu_dtype)

    scores = jnp.einsum('gvd,gsd->gvs', qp3, kp3,
                        preferred_element_type=jnp.float32)
    scores = scores + mask_ref[...][None]          # block-diagonal mask

    # Numerically-stable softmax, kept entirely in f32 (VPU/EUP path; v5e-safe).
    scores = scores - jnp.max(scores, axis=-1, keepdims=True)
    e = jnp.exp(scores)
    denom = jnp.sum(e, axis=-1, keepdims=True)
    attn = e * pl.reciprocal(denom, approx=True)   # EUP vrcp: off the VPU path
    # TODO(synk): training-mode dropout on `attn` omitted (eval mode -> identity).

    out = jnp.einsum('gvs,gsd->gvd', attn.astype(mxu_dtype), vp3,
                     preferred_element_type=jnp.float32)

    # ---- output projection (flattened M again) ------------------------------
    res = jnp.dot(out.reshape(bt * nq, D).astype(mxu_dtype), wo_ref[...],
                  preferred_element_type=jnp.float32) + bo_ref[...]
    o_ref[...] = res.astype(o_ref.dtype)


def _pick_batch_block(B, V, S, *, target_rows=8192, min_grid=4):
    """Largest divisor `bt` of B such that
       * the flattened (bt*V, D) / (bt*S, D) blocks are sublane(8)-legal,
       * the tile stays under ~target_rows activation rows, and
       * at least min(min_grid, B) grid steps remain (feeds both v7x
         TensorCores and keeps the DMA pipeline double-buffered)."""
    def legal(bt):
        q_ok = (bt * V) % 8 == 0 or bt == B
        k_ok = (bt * S) % 8 == 0 or bt == B
        return q_ok and k_ok

    divisors = [d for d in range(1, B + 1) if B % d == 0 and legal(d)]
    if not divisors:
        return B
    want_grid = min(min_grid, B)
    fits = [d for d in divisors if d * max(V, S) <= target_rows]
    cands = [d for d in fits if B // d >= want_grid]
    if cands:
        return max(cands)
    if fits:
        return max(fits)
    return min(divisors)


def _pick_group(bt, V, S, *, max_lanes=128, max_rows=512):
    """Largest divisor of bt packing several batch elements into one dense
    (group*V, group*S) block-diagonal score matrix (lane-dense softmax, fewer
    and fatter MXU passes).  Keeps group*V / group*S sublane(8)-aligned so the
    in-kernel reshapes stay free relabels."""
    best = 1
    for g in range(1, bt + 1):
        if bt % g:
            continue
        if g * S > max_lanes or g * V > max_rows:
            continue
        if g == 1 or ((g * V) % 8 == 0 and (g * S) % 8 == 0):
            best = g
    return best


def atten_forward(queries, keys, values, params, *,
                  mxu_dtype=jnp.bfloat16, batch_block=None):
    """queries: (B, V, D), keys/values: (B, S, D). Returns (B, V, D)."""
    B, V, D = queries.shape
    _, S, _ = keys.shape
    wq, bq, wk, bk, wo, bo = params
    scale = 1.0 / math.sqrt(D)

    bt = batch_block if batch_block is not None else _pick_batch_block(B, V, S)
    assert B % bt == 0, "batch_block must divide the batch size"
    assert (bt * V) % 8 == 0 or bt == B, "query block is not sublane-aligned"
    assert (bt * S) % 8 == 0 or bt == B, "key/value block is not sublane-aligned"
    grid = (B // bt,)

    group = _pick_group(bt, V, S)
    gq, gk = group * V, group * S

    # Flatten batch into the matmul M dimension (free row-major reshapes).
    q2d = queries.reshape(B * V, D)
    k2d = keys.reshape(B * S, D)
    v2d = values.reshape(B * S, D)

    # Fold the 1/sqrt(D) score scale into the query projection (trace-time
    # constant rescale of a DxD weight + bias): removes a full-tile VPU
    # multiply per step.  Weights are pre-cast to the MXU operand dtype;
    # biases stay f32 and are added after f32 accumulation.
    wq_m = (wq.astype(jnp.float32) * scale).astype(mxu_dtype)
    bq32 = bq.astype(jnp.float32) * scale
    wk_m = wk.astype(mxu_dtype)
    bk32 = bk.astype(jnp.float32)
    wo_m = wo.astype(mxu_dtype)
    bo32 = bo.astype(jnp.float32)

    # Block-diagonal additive mask for the cross-batch grouped score matrix.
    rb = np.arange(gq) // V
    cb = np.arange(gk) // S
    mask = jnp.asarray(
        np.where(rb[:, None] == cb[None, :], 0.0, NEG_BIG).astype(np.float32))

    act_spec = lambda rows: pl.BlockSpec((bt * rows, D), lambda i: (i, 0))
    const2d = lambda r, c: pl.BlockSpec((r, c), lambda i: (0, 0))

    kernel = functools.partial(
        atten_kernel, bt=bt, nq=V, nk=S, group=group, mxu_dtype=mxu_dtype)

    # Advisory cost estimate so XLA can schedule around the custom call.
    in_bpe = jnp.dtype(queries.dtype).itemsize
    w_bpe = jnp.dtype(mxu_dtype).itemsize
    flops = (2 * D * D * (B * V + 2 * B * S)      # input projections
             + 2 * B * V * gk * D                 # q @ k^T (grouped, masked)
             + 2 * B * V * gk * D                 # attn @ v
             + 2 * B * V * D * D)                 # output projection
    bytes_accessed = (in_bpe * (2 * B * V * D + 2 * B * S * D)
                      + 3 * D * D * w_bpe + 3 * D * 4 + gq * gk * 4)
    cost = pl.CostEstimate(flops=int(flops),
                           transcendentals=int(B * V * gk),
                           bytes_accessed=int(bytes_accessed))

    # VMEM budget: double-buffered activation/output blocks, resident weights
    # and mask, plus in-kernel temporaries (f32 projections, MXU-dtype casts,
    # scores/e/attn, grouped output).  Only raise the scoped limit when the
    # conservative default would be exceeded; cap well below v7x's 64 MiB.
    rows_q, rows_k = bt * V, bt * S
    io_bytes = 2 * in_bpe * (rows_q + 2 * rows_k) * D + 2 * in_bpe * rows_q * D
    w_bytes = 2 * (3 * D * D * w_bpe + 3 * D * 4 + gq * gk * 4)
    tmp_bytes = (4 * (rows_q + 2 * rows_k) * D            # f32 qp/kp/vp
                 + 2 * w_bpe * (rows_q + 2 * rows_k) * D  # MXU casts
                 + 3 * 4 * rows_q * gk                    # scores / e / attn
                 + 2 * 4 * rows_q * D)                    # out / res
    vmem_est = io_bytes + w_bytes + tmp_bytes
    compiler_kwargs = dict(dimension_semantics=("parallel",))
    if vmem_est > 12 * 1024 * 1024:
        compiler_kwargs["vmem_limit_bytes"] = int(
            min(vmem_est * 3 // 2, 48 * 1024 * 1024))
    # NOTE: if xprof still shows exposed DMA (wall >> compute), bump the three
    # activation in_specs to pipeline_mode=pl.Buffered(3) and re-sweep.

    out2d = pl.pallas_call(
        kernel,
        out_shape=jax.ShapeDtypeStruct((B * V, D), queries.dtype),
        grid=grid,
        in_specs=[
            act_spec(V),                     # queries (flattened)
            act_spec(S),                     # keys
            act_spec(S),                     # values
            const2d(gq, gk),                 # block-diagonal mask
            const2d(D, D), const2d(1, D),    # query_projection (pre-scaled)
            const2d(D, D), const2d(1, D),    # kv_projection (shared by K and V)
            const2d(D, D), const2d(1, D),    # out_projection
        ],
        out_specs=pl.BlockSpec((bt * V, D), lambda i: (i, 0)),
        compiler_params=pltpu.CompilerParams(**compiler_kwargs),
        cost_estimate=cost,
    )(q2d, k2d, v2d, mask, wq_m, bq32, wk_m, bk32, wo_m, bo32)

    return out2d.reshape(B, V, D)


def reference_forward(queries, keys, values, params):
    wq, bq, wk, bk, wo, bo = params
    D = queries.shape[-1]
    scale = 1.0 / math.sqrt(D)
    qp = queries @ wq + bq
    kp = keys @ wk + bk
    vp = values @ wk + bk
    scores = jnp.einsum('bvd,bsd->bvs', qp, kp) * scale
    attn = jax.nn.softmax(scores, axis=-1)
    out = jnp.einsum('bvs,bsd->bvd', attn, vp)
    return out @ wo + bo


def init_params(key, d_model, dtype=jnp.float32):
    """Deterministic synthetic parameters.

    Weights are stored as (D_in, D_out) so the kernel computes x @ W + b
    (equivalent to PyTorch's x @ W_pt.T + b).
    """
    ks = jax.random.split(key, 6)
    lim = 1.0 / math.sqrt(d_model)
    wq = jax.random.uniform(ks[0], (d_model, d_model), dtype, -lim, lim)
    bq = jax.random.uniform(ks[1], (1, d_model), dtype, -lim, lim)
    wk = jax.random.uniform(ks[2], (d_model, d_model), dtype, -lim, lim)
    bk = jax.random.uniform(ks[3], (1, d_model), dtype, -lim, lim)
    wo = jax.random.uniform(ks[4], (d_model, d_model), dtype, -lim, lim)
    bo = jax.random.uniform(ks[5], (1, d_model), dtype, -lim, lim)
    return (wq, bq, wk, bk, wo, bo)


if __name__ == "__main__":
    key = jax.random.PRNGKey(0)
    k_q, k_k, k_v, k_p = jax.random.split(key, 4)

    # --- primary (module-spec) shapes: B=2, V=S=8, D=32 ----------------------
    B, V, S, D = 2, 8, 8, 32
    queries = jax.random.normal(k_q, (B, V, D), jnp.float32)
    keys = jax.random.normal(k_k, (B, S, D), jnp.float32)
    values = jax.random.normal(k_v, (B, S, D), jnp.float32)
    params = init_params(k_p, D)
    ref = reference_forward(queries, keys, values, params)

    # bf16 MXU path (default on all generations, incl. v5e): loose tolerance.
    out_bf16 = jax.block_until_ready(
        atten_forward(queries, keys, values, params))
    assert out_bf16.shape == (B, V, D)
    errbf = jnp.max(jnp.abs(out_bf16 - ref))
    assert jnp.allclose(out_bf16, ref, atol=1e-1, rtol=1e-1), \
        f"bf16 path max abs err = {errbf}"

    # f32 MXU path: tight structural check (only the approx reciprocal differs).
    out_f32 = jax.block_until_ready(
        atten_forward(queries, keys, values, params, mxu_dtype=jnp.float32))
    err32 = jnp.max(jnp.abs(out_f32 - ref))
    assert jnp.allclose(out_f32, ref, atol=1e-2, rtol=1e-2), \
        f"f32 path max abs err = {err32}"

    # --- larger batch: exercises the cross-batch grouped/masked attention ----
    B2 = 32
    q2 = jax.random.normal(jax.random.fold_in(k_q, 1), (B2, V, D), jnp.float32)
    k2 = jax.random.normal(jax.random.fold_in(k_k, 1), (B2, S, D), jnp.float32)
    v2 = jax.random.normal(jax.random.fold_in(k_v, 1), (B2, S, D), jnp.float32)
    ref2 = reference_forward(q2, k2, v2, params)
    out2 = jax.block_until_ready(
        atten_forward(q2, k2, v2, params, mxu_dtype=jnp.float32))
    err2 = jnp.max(jnp.abs(out2 - ref2))
    assert jnp.allclose(out2, ref2, atol=1e-2, rtol=1e-2), \
        f"grouped f32 path max abs err = {err2}"

    print("KERNEL_OK")
</pallas_src>

<mosaic_0001>
module attributes {stable_mosaic.version = 11 : i64} {
  func.func @atten_kernel(%arg0: i32, %arg1: memref<8x32xf32, #tpu.memory_space<vmem>>, %arg2: memref<8x32xf32, #tpu.memory_space<vmem>>, %arg3: memref<8x32xf32, #tpu.memory_space<vmem>>, %arg4: memref<8x8xf32, #tpu.memory_space<vmem>>, %arg5: memref<32x32xbf16, #tpu.memory_space<vmem>>, %arg6: memref<1x32xf32, #tpu.memory_space<vmem>>, %arg7: memref<32x32xbf16, #tpu.memory_space<vmem>>, %arg8: memref<1x32xf32, #tpu.memory_space<vmem>>, %arg9: memref<32x32xbf16, #tpu.memory_space<vmem>>, %arg10: memref<1x32xf32, #tpu.memory_space<vmem>>, %arg11: memref<8x32xf32, #tpu.memory_space<vmem>>) attributes {dimension_semantics = [#tpu.dimension_semantics<parallel>], iteration_bounds = array<i64: 2>, scalar_prefetch = 0 : i64, scratch_operands = 0 : i64, tpu.core_type = #tpu.core_type<tc>, window_params = [{transform_indices = @transform_0, window_bounds = array<i64: 8, 32>}, {transform_indices = @transform_1, window_bounds = array<i64: 8, 32>}, {transform_indices = @transform_2, window_bounds = array<i64: 8, 32>}, {pipeline_mode = #tpu.pipeline_mode<synchronous>, transform_indices = @transform_3, window_bounds = array<i64: 8, 8>}, {pipeline_mode = #tpu.pipeline_mode<synchronous>, transform_indices = @transform_4, window_bounds = array<i64: 32, 32>}, {pipeline_mode = #tpu.pipeline_mode<synchronous>, transform_indices = @transform_5, window_bounds = array<i64: 1, 32>}, {pipeline_mode = #tpu.pipeline_mode<synchronous>, transform_indices = @transform_6, window_bounds = array<i64: 32, 32>}, {pipeline_mode = #tpu.pipeline_mode<synchronous>, transform_indices = @transform_7, window_bounds = array<i64: 1, 32>}, {pipeline_mode = #tpu.pipeline_mode<synchronous>, transform_indices = @transform_8, window_bounds = array<i64: 32, 32>}, {pipeline_mode = #tpu.pipeline_mode<synchronous>, transform_indices = @transform_9, window_bounds = array<i64: 1, 32>}, {transform_indices = @transform_10, window_bounds = array<i64: 8, 32>}]} {
    %c0 = arith.constant 0 : index
    %c0_0 = arith.constant 0 : index
    %0 = vector.load %arg1[%c0, %c0_0] : memref<8x32xf32, #tpu.memory_space<vmem>>, vector<8x32xf32>
    %1 = arith.truncf %0 : vector<8x32xf32> to vector<8x32xbf16>
    %c0_1 = arith.constant 0 : index
    %c0_2 = arith.constant 0 : index
    %2 = vector.load %arg5[%c0_1, %c0_2] : memref<32x32xbf16, #tpu.memory_space<vmem>>, vector<32x32xbf16>
    %cst = arith.constant dense<0.000000e+00> : vector<8x32xf32>
    %3 = tpu.matmul %1, %2, %cst {dimension_numbers = #tpu.dot_dimension_numbers<[1], [0], [0], [1], [0, 0, 1, 1], [], []>} : vector<8x32xbf16>, vector<32x32xbf16>, vector<8x32xf32> -> vector<8x32xf32>
    %c0_3 = arith.constant 0 : index
    %c0_4 = arith.constant 0 : index
    %4 = vector.load %arg6[%c0_3, %c0_4] : memref<1x32xf32, #tpu.memory_space<vmem>>, vector<1x32xf32>
    %5 = vector.broadcast %4 : vector<1x32xf32> to vector<8x32xf32>
    %6 = arith.addf %3, %5 : vector<8x32xf32>
    %c0_5 = arith.constant 0 : index
    %c0_6 = arith.constant 0 : index
    %7 = vector.load %arg2[%c0_5, %c0_6] : memref<8x32xf32, #tpu.memory_space<vmem>>, vector<8x32xf32>
    %8 = arith.truncf %7 : vector<8x32xf32> to vector<8x32xbf16>
    %c0_7 = arith.constant 0 : index
    %c0_8 = arith.constant 0 : index
    %9 = vector.load %arg7[%c0_7, %c0_8] : memref<32x32xbf16, #tpu.memory_space<vmem>>, vector<32x32xbf16>
    %cst_9 = arith.constant dense<0.000000e+00> : vector<8x32xf32>
    %10 = tpu.matmul %8, %9, %cst_9 {dimension_numbers = #tpu.dot_dimension_numbers<[1], [0], [0], [1], [0, 0, 1, 1], [], []>} : vector<8x32xbf16>, vector<32x32xbf16>, vector<8x32xf32> -> vector<8x32xf32>
    %c0_10 = arith.constant 0 : index
    %c0_11 = arith.constant 0 : index
    %11 = vector.load %arg8[%c0_10, %c0_11] : memref<1x32xf32, #tpu.memory_space<vmem>>, vector<1x32xf32>
    %12 = vector.broadcast %11 : vector<1x32xf32> to vector<8x32xf32>
    %13 = arith.addf %10, %12 : vector<8x32xf32>
    %c0_12 = arith.constant 0 : index
    %c0_13 = arith.constant 0 : index
    %14 = vector.load %arg3[%c0_12, %c0_13] : memref<8x32xf32, #tpu.memory_space<vmem>>, vector<8x32xf32>
    %15 = arith.truncf %14 : vector<8x32xf32> to vector<8x32xbf16>
    %c0_14 = arith.constant 0 : index
    %c0_15 = arith.constant 0 : index
    %16 = vector.load %arg7[%c0_14, %c0_15] : memref<32x32xbf16, #tpu.memory_space<vmem>>, vector<32x32xbf16>
    %cst_16 = arith.constant dense<0.000000e+00> : vector<8x32xf32>
    %17 = tpu.matmul %15, %16, %cst_16 {dimension_numbers = #tpu.dot_dimension_numbers<[1], [0], [0], [1], [0, 0, 1, 1], [], []>} : vector<8x32xbf16>, vector<32x32xbf16>, vector<8x32xf32> -> vector<8x32xf32>
    %c0_17 = arith.constant 0 : index
    %c0_18 = arith.constant 0 : index
    %18 = vector.load %arg8[%c0_17, %c0_18] : memref<1x32xf32, #tpu.memory_space<vmem>>, vector<1x32xf32>
    %19 = vector.broadcast %18 : vector<1x32xf32> to vector<8x32xf32>
    %20 = arith.addf %17, %19 : vector<8x32xf32>
    %21 = vector.shape_cast %6 : vector<8x32xf32> to vector<1x8x32xf32>
    %22 = arith.truncf %21 : vector<1x8x32xf32> to vector<1x8x32xbf16>
    %23 = vector.shape_cast %13 : vector<8x32xf32> to vector<1x8x32xf32>
    %24 = arith.truncf %23 : vector<1x8x32xf32> to vector<1x8x32xbf16>
    %25 = vector.shape_cast %20 : vector<8x32xf32> to vector<1x8x32xf32>
    %26 = arith.truncf %25 : vector<1x8x32xf32> to vector<1x8x32xbf16>
    "tpu.trace_start"() <{level = 10 : i32, message = "gvd,gsd->gvs"}> : () -> ()
    %cst_19 = arith.constant dense<0.000000e+00> : vector<1x8x8xf32>
    %27 = tpu.matmul %22, %24, %cst_19 {dimension_numbers = #tpu.dot_dimension_numbers<[2], [2], [1], [1], [0, 0, 0, 1, 1, 1], [0], [0]>} : vector<1x8x32xbf16>, vector<1x8x32xbf16>, vector<1x8x8xf32> -> vector<1x8x8xf32>
    "tpu.trace_stop"() : () -> ()
    %c0_20 = arith.constant 0 : index
    %c0_21 = arith.constant 0 : index
    %28 = vector.load %arg4[%c0_20, %c0_21] : memref<8x8xf32, #tpu.memory_space<vmem>>, vector<8x8xf32>
    %29 = vector.shape_cast %28 : vector<8x8xf32> to vector<1x8x8xf32>
    %30 = arith.addf %27, %29 : vector<1x8x8xf32>
    %cst_22 = arith.constant dense<0xFF800000> : vector<1x8xf32>
    %31 = vector.multi_reduction <maximumf>, %30, %cst_22 [2] : vector<1x8x8xf32> to vector<1x8xf32>
    %32 = vector.shape_cast %31 : vector<1x8xf32> to vector<1x8x1xf32>
    %33 = vector.broadcast %32 : vector<1x8x1xf32> to vector<1x8x8xf32>
    %34 = arith.subf %30, %33 : vector<1x8x8xf32>
    %35 = math.exp %34 : vector<1x8x8xf32>
    %cst_23 = arith.constant dense<0.000000e+00> : vector<1x8xf32>
    %36 = vector.multi_reduction <add>, %35, %cst_23 [2] : vector<1x8x8xf32> to vector<1x8xf32>
    %37 = vector.shape_cast %36 : vector<1x8xf32> to vector<1x8x1xf32>
    %38 = tpu.reciprocal %37 {approx = true} : vector<1x8x1xf32> -> vector<1x8x1xf32>
    %39 = vector.broadcast %38 : vector<1x8x1xf32> to vector<1x8x8xf32>
    %40 = arith.mulf %35, %39 : vector<1x8x8xf32>
    %41 = arith.truncf %40 : vector<1x8x8xf32> to vector<1x8x8xbf16>
    "tpu.trace_start"() <{level = 10 : i32, message = "gvs,gsd->gvd"}> : () -> ()
    %cst_24 = arith.constant dense<0.000000e+00> : vector<1x8x32xf32>
    %42 = tpu.matmul %41, %26, %cst_24 {dimension_numbers = #tpu.dot_dimension_numbers<[2], [1], [1], [2], [0, 0, 0, 1, 1, 2], [0], [0]>} : vector<1x8x8xbf16>, vector<1x8x32xbf16>, vector<1x8x32xf32> -> vector<1x8x32xf32>
    "tpu.trace_stop"() : () -> ()
    %43 = vector.shape_cast %42 : vector<1x8x32xf32> to vector<8x32xf32>
    %44 = arith.truncf %43 : vector<8x32xf32> to vector<8x32xbf16>
    %c0_25 = arith.constant 0 : index
    %c0_26 = arith.constant 0 : index
    %45 = vector.load %arg9[%c0_25, %c0_26] : memref<32x32xbf16, #tpu.memory_space<vmem>>, vector<32x32xbf16>
    %cst_27 = arith.constant dense<0.000000e+00> : vector<8x32xf32>
    %46 = tpu.matmul %44, %45, %cst_27 {dimension_numbers = #tpu.dot_dimension_numbers<[1], [0], [0], [1], [0, 0, 1, 1], [], []>} : vector<8x32xbf16>, vector<32x32xbf16>, vector<8x32xf32> -> vector<8x32xf32>
    %c0_28 = arith.constant 0 : index
    %c0_29 = arith.constant 0 : index
    %47 = vector.load %arg10[%c0_28, %c0_29] : memref<1x32xf32, #tpu.memory_space<vmem>>, vector<1x32xf32>
    %48 = vector.broadcast %47 : vector<1x32xf32> to vector<8x32xf32>
    %49 = arith.addf %46, %48 : vector<8x32xf32>
    %c0_30 = arith.constant 0 : index
    %c0_31 = arith.constant 0 : index
    %50 = vector.load %arg11[%c0_30, %c0_31] : memref<8x32xf32, #tpu.memory_space<vmem>>, vector<8x32xf32>
    tpu.vector_store %arg11[%c0_30, %c0_31], %49 {strides = array<i32>} : memref<8x32xf32, #tpu.memory_space<vmem>>, vector<8x32xf32>,
    return
  }
  func.func @transform_0(%arg0: i32) -> (i32, i32) {
    %c0_i32 = arith.constant 0 : i32
    %c0_i32_0 = arith.constant 0 : i32
    return %arg0, %c0_i32 : i32, i32
  }
  func.func @transform_1(%arg0: i32) -> (i32, i32) {
    %c0_i32 = arith.constant 0 : i32
    %c0_i32_0 = arith.constant 0 : i32
    return %arg0, %c0_i32 : i32, i32
  }
  func.func @transform_2(%arg0: i32) -> (i32, i32) {
    %c0_i32 = arith.constant 0 : i32
    %c0_i32_0 = arith.constant 0 : i32
    return %arg0, %c0_i32 : i32, i32
  }
  func.func @transform_3(%arg0: i32) -> (i32, i32) {
    %c0_i32 = arith.constant 0 : i32
    %c0_i32_0 = arith.constant 0 : i32
    %c0_i32_1 = arith.constant 0 : i32
    return %c0_i32, %c0_i32_0 : i32, i32
  }
  func.func @transform_4(%arg0: i32) -> (i32, i32) {
    %c0_i32 = arith.constant 0 : i32
    %c0_i32_0 = arith.constant 0 : i32
    %c0_i32_1 = arith.constant 0 : i32
    return %c0_i32, %c0_i32_0 : i32, i32
  }
  func.func @transform_5(%arg0: i32) -> (i32, i32) {
    %c0_i32 = arith.constant 0 : i32
    %c0_i32_0 = arith.constant 0 : i32
    %c0_i32_1 = arith.constant 0 : i32
    return %c0_i32, %c0_i32_0 : i32, i32
  }
  func.func @transform_6(%arg0: i32) -> (i32, i32) {
    %c0_i32 = arith.constant 0 : i32
    %c0_i32_0 = arith.constant 0 : i32
    %c0_i32_1 = arith.constant 0 : i32
    return %c0_i32, %c0_i32_0 : i32, i32
  }
  func.func @transform_7(%arg0: i32) -> (i32, i32) {
    %c0_i32 = arith.constant 0 : i32
    %c0_i32_0 = arith.constant 0 : i32
    %c0_i32_1 = arith.constant 0 : i32
    return %c0_i32, %c0_i32_0 : i32, i32
  }
  func.func @transform_8(%arg0: i32) -> (i32, i32) {
    %c0_i32 = arith.constant 0 : i32
    %c0_i32_0 = arith.constant 0 : i32
    %c0_i32_1 = arith.constant 0 : i32
    return %c0_i32, %c0_i32_0 : i32, i32
  }
  func.func @transform_9(%arg0: i32) -> (i32, i32) {
    %c0_i32 = arith.constant 0 : i32
    %c0_i32_0 = arith.constant 0 : i32
    %c0_i32_1 = arith.constant 0 : i32
    return %c0_i32, %c0_i32_0 : i32, i32
  }
  func.func @transform_10(%arg0: i32) -> (i32, i32) {
    %c0_i32 = arith.constant 0 : i32
    %c0_i32_0 = arith.constant 0 : i32
    return %arg0, %c0_i32 : i32, i32
  }
}

</mosaic_0001>

<bundles_post_ra>
// kernel: tpu_custom_call.1
= control target key start
LH: loop header
LB: loop body
LE: loop exit
PB: predicated region body
PF: predicated region fallthrough
CT: control target
= control target key end

     0   :  { %s1905_s0 = inlined_call_operand.hbm [shape: f32[16,32], index: 0, kind: input, shape index: {}]   ;;  %s1906_s1 = inlined_call_operand.hbm [shape: f32[16,32], index: 1, kind: input, shape index: {}]   ;;  %s1907_s2 = inlined_call_operand.hbm [shape: f32[16,32], index: 2, kind: input, shape index: {}]   ;;  %s1908_s3 = inlined_call_operand.hbm [shape: f32[8,8], index: 3, kind: input, shape index: {}]   ;;  %s1909_s4 = inlined_call_operand.hbm [shape: bf16[32,32], index: 4, kind: input, shape index: {}]   ;;  %s1910_s5 = inlined_call_operand.vmem [shape: f32[1,32], index: 5, kind: input, shape index: {}]   ;;  %s1911_s6 = inlined_call_operand.vmem [shape: bf16[32,32], index: 6, kind: input, shape index: {}]   ;;  %s1912_s7 = inlined_call_operand.vmem [shape: f32[1,32], index: 7, kind: input, shape index: {}]   ;;  %s1913_s8 = inlined_call_operand.hbm [shape: bf16[32,32], index: 8, kind: input, shape index: {}]   ;;  %s1914_s9 = inlined_call_operand.vmem [shape: f32[1,32], index: 9, kind: input, shape index: {}]   ;;  %s1915_s10 = inlined_call_operand.hbm [shape: f32[16,32], index: 10, kind: output, shape index: {}]  }
   0x1   :  { %1938 = sst [smem:[#allocation25_spill]] %s1906_s1 }
   0x2   :  { %1939 = sst [smem:[#allocation26_spill]] %s1908_s3 }
   0x3   :  { %1940 = sst [smem:[#allocation27_spill]] %s1910_s5 }
   0x4   :  { %1941 = sst [smem:[#allocation28_spill]] %s1911_s6 }
   0x5   :  { %1942 = sst [smem:[#allocation29_spill]] %s1912_s7 }
   0x6   :  { %1943 = sst [smem:[#allocation30_spill]] %s1914_s9 }
   0x7   :  { %1944 = sst [smem:[#allocation31_spill]] %s1915_s10 }
   0x8   :  { %15 = vsyncpa [#allocation3], 0 }
   0x9   :  { %17 = vsyncpa [#allocation3 + $0x1], 0 }
   0xa   :  { %18 = vsyncpa [#allocation6], 0 }
   0xb   :  { %20 = vsyncpa [#allocation6 + $0x1], 0 }
   0xc   :  { %21 = vsyncpa [#allocation9], 0 }
   0xd   :  { %22 = vsyncpa [#allocation12], 0 }
   0xe   :  { %23 = vsyncpa [#allocation4], 0 }
   0xf   :  { %25 = vsyncpa [#allocation4 + $0x1], 0  ;;  %s1525_s13 = smov 0   ;;  %s1527_s14 = smov 0  }
  0x10   :  { %s1529_s15 = smov 0   ;;  %s1531_s16 = smov 0  }
  0x11 LB: > { %1945 = sst [smem:[#allocation19_spill]] %s1445_s13  ;;  %s1546_s17 = sadd.s32 4294967295, %s1457_s16   ;;  %s1457_s16 = sphi %s1531_s16, %s1990_s16   ;;  %s1453_s15 = sphi %s1529_s15, %s1994_s15   ;;  %s1449_s14 = sphi %s1527_s14, %s1993_s14   ;;  %s1445_s13 = sphi %s1525_s13, %s1992_s13  }
  0x12   : > { %1946 = sst [smem:[#allocation20_spill]] %s1457_s16  ;;  %s1005_s18 = sadd.s32 4294967294, %s1457_s16  }
  0x13   : > { %p51_p0 = scmp.ne.s32.totalorder %s1449_s14, %s1445_s13  ;;  %p1918_p1 = scmp.eq.s32.totalorder %s1546_s17, 0 }
  0x14   : > { %p280_p3 = scmp.eq.s32.totalorder %s1005_s18, 1  ;;  %p1006_p5 = scmp.ge.s32.totalorder %s1457_s16, 1 }
  0x15   : > { %p1555_p4 = por %p1918_p1, %p51_p0  ;;  %p287_p7 = scmp.lt.s32.totalorder %s1457_s16, 3 }
  0x16   : > { %p1560_p6 = por %p280_p3, %p51_p0  ;;  %s1459_s22 = smov [#allocation8]  }
  0x17   : > { %s1947_s19 = scalar_select %p1555_p4, 1, 0 }
  0x18   : > { %s1948_s20 = scalar_select %p1560_p6, 1, 0 }
  0x19   : > { %p1565_p8 = pnand %p1006_p5, %p287_p7  ;;  %s300_s23 = sshll.u32 %s1459_s22, 4  ;;  %s301_s23 = int_to_ptr.vmem [resolvable:$true] %s300_s23 }
  0x1a   : > { %1949 = sst [smem:[#allocation21_spill]] %s1948_s20  ;;  %s1573_s24 = sadd.s32 1, %s1457_s16  }
  0x1b   : > { %s1950_s21 = scalar_select %p1565_p8, 1, 0 }
  0x1c   : > { %p1124_p10 = pneg %p1565_p8  ;;  %1951 = sst [smem:[#allocation22_spill]] %s1573_s24 }
  0x1d   : > { %s35_s26 = ssub.s32 %s1457_s16, %s1573_s24  ;;  %s38_s28 = sadd.s32 1, %s1453_s15 }
  0x1e   : > { %p1577_p11 = pnand %p1124_p10, %p1918_p1  ;;  %p1583_p12 = scmp.eq.s32.totalorder %s35_s26, 0 }
  0x1f   : > { %s1954_s3 = sld [smem:[#allocation26_spill]] }
  0x20   : > { %s1952_s25 = scalar_select %p1577_p11, 1, 0 }
  0x21   : > { %s1953_s27 = scalar_select %p1583_p12, 1, 0 }
  0x22   : > { %p1598_p3 = pneg %p1577_p11 }
  0x24   : > { %s1955_s22 = scalar_select %p1598_p3, 1, 0 }
  0x25   : > { %s1205_s11 = scalar_lea.hbm %s1954_s3, 128 }
  0x26   : > { %p1206_p0 = scmp.ne.s32.totalorder %s1954_s3, %s1205_s11  ;;  %p1212_p10 = scmp.lt.u32.totalorder %s1205_s11, %s1954_s3 }
  0x28   : > { %p1208_p5 = pnand %p1598_p3, %p1206_p0 }
  0x2a   : > { %p1209_p7 = pneg %p1208_p5 }
  0x2c   : > { %p1214_p9 = pnand %p1212_p10, %p1209_p7 }
  0x2e   : > { %1217 = shalt.err (!%p1214_p9)
}
  0x2f   : > { %s1218_s29 = scalar_lea.vmem %s301_s23, 128  ;;  %p1226_p6 = scmp.lt.s32.totalorder %s301_s23, %s301_s23 }
  0x30   : > { %p1219_p1 = scmp.ne.s32.totalorder %s301_s23, %s1218_s29  ;;  %p1227_p4 = scmp.lt.s32.totalorder %s1218_s29, %s1218_s29 }
  0x32   : > { %p1221_p2 = pnand %p1219_p1, %p1598_p3  ;;  %p1228_p8 = por %p1227_p4, %p1226_p6 }
  0x34   : > { %p1222_p13 = pneg %p1221_p2 }
  0x36   : > { %p1229_p12 = pnand %p1228_p8, %p1222_p13 }
  0x38   : > { %1232 = shalt.err (!%p1229_p12)
}
  0x39   : > { %1127 = dma.hbm_to_vmem [thread:$0]  (!%p1577_p11), %s1954_s3, 128, %s301_s23, [#allocation9]  }
  0x3a   : > { %p1956_p1 = scmp.ne.s32.totalorder %s1953_s27, 0  ;;  %p46_p2 = scmp.eq.s32.totalorder %s1457_s16, 0 }
  0x3b   : > { %p1958_p4 = scmp.ne.s32.totalorder %s1453_s15, %s1449_s14  ;;  %p1959_p6 = scmp.eq.s32.totalorder %s1546_s17, 1 }
  0x3c   : > { %s1617_s24 = scalar_select %p1956_p1, %s1453_s15, %s38_s28  }
  0x3d   : > { %p1625_p8 = por %p1959_p6, %p1958_p4  ;;  %p1151_p9 = scmp.lt.s32.totalorder %s1457_s16, 2 }
  0x3e   : > { %1957 = sst [smem:[#allocation23_spill]] %s1617_s24  ;;  %s1921_s18 = sand.u32 1, %s1453_s15  }
  0x3f   : > { %s1960_s11 = scalar_select %p1625_p8, 1, 0 }
  0x40   : > { %p1962_p12 = pmov %p1958_p4  ;;  %s1636_s26 = sshll.u32 %s1921_s18, 3 }
  0x41   : > { %1961 = sst [smem:[#allocation24_spill]] %s1960_s11  ;;  %s1639_s29 = sshll.u32 %s1457_s16, 7 }
  0x42   : > { %p47_p13 = por %p46_p2, %p1962_p12  ;;  %s367_s23 = sand.u32 1, %s1457_s16  }
  0x43   : > { %s1964_s1 = sld [smem:[#allocation25_spill]]  ;;  %s371_s18 = scalar_lea.vmem [#allocation5], %s1636_s26 }
  0x44   : > { %p1642_p0 = pnand %p1151_p9, %p47_p13  ;;  %s378_s3 = sshll.u32 %s371_s18, 4  ;;  %s1653_s3 = int_to_ptr.vmem [resolvable:$true] %s378_s3 }
  0x45   : > { %s1655_s24 = scalar_lea.sflag [#allocation6], %s367_s23 }
  0x46   : > { %s1963_s27 = scalar_select %p1642_p0, 1, 0 }
  0x47   : > { %p1661_p7 = pneg %p1642_p0 }
  0x49   : > { %s1650_s12 = scalar_lea.hbm %s1964_s1, %s1639_s29  ;;  %s1238_s13 = scalar_lea.hbm %s1964_s1, 256 }
  0x4a   : > { %s1233_s16 = scalar_lea.hbm %s1650_s12, 128  ;;  %p1239_p2 = scmp.lt.u32.totalorder %s1650_s12, %s1964_s1 }
  0x4b   : > { %p1234_p5 = scmp.ne.s32.totalorder %s1650_s12, %s1233_s16  ;;  %p1240_p4 = scmp.lt.u32.totalorder %s1238_s13, %s1233_s16 }
  0x4c   : > { %s1965_s20 = scalar_select %p1661_p7, 1, 0 }
  0x4d   : > { %p1236_p10 = pnand %p1661_p7, %p1234_p5  ;;  %p1241_p6 = por %p1240_p4, %p1239_p2 }
  0x4e   : > { %p1242_p9 = scmp.lt.u32.totalorder %s1233_s16, %s1650_s12 }
  0x4f   : > { %p1237_p1 = pneg %p1236_p10 }
  0x50   : > { %p1243_p12 = por %p1242_p9, %p1241_p6 }
  0x52   : > { %p1244_p13 = pnand %p1243_p12, %p1237_p1 }
  0x54   : > { %1247 = shalt.err (!%p1244_p13)
}
  0x55   : > { %s1248_s23 = scalar_lea.vmem %s1653_s3, 128  ;;  %s1460_s28 = smov [#allocation5]  }
  0x56   : > { %p1249_p5 = scmp.ne.s32.totalorder %s1653_s3, %s1248_s23  ;;  %s1253_s30 = sshll.u32 %s1460_s28, 4  ;;  %s1254_s30 = int_to_ptr.vmem [resolvable:$false] %s1253_s30 }
  0x57   : > { %s1255_s10 = scalar_lea.vmem %s1254_s30, 256  ;;  %p1256_p11 = scmp.lt.s32.totalorder %s1653_s3, %s1254_s30 }
  0x58   : > { %p1251_p10 = pnand %p1249_p5, %p1661_p7  ;;  %p1257_p3 = scmp.lt.s32.totalorder %s1255_s10, %s1248_s23 }
  0x5a   : > { %p1252_p8 = pneg %p1251_p10  ;;  %p1258_p2 = por %p1257_p3, %p1256_p11 }
  0x5c   : > { %p1259_p4 = pnand %p1258_p2, %p1252_p8 }
  0x5e   : > { %1262 = shalt.err (!%p1259_p4)
}
  0x5f   : > { %1140 = dma.hbm_to_vmem [thread:$0]  (!%p1642_p0), %s1650_s12, 128, %s1653_s3, %s1655_s24  }
  0x60   : > { %s1461_s13 = smov [#allocation10]   ;;  %s1263_s28 = scalar_lea.hbm %s1909_s4, 256 }
  0x61   : > { %s310_s16 = sshll.u32 %s1461_s13, 4  ;;  %p1264_p11 = scmp.ne.s32.totalorder %s1909_s4, %s1263_s28  ;;  %s311_s16 = int_to_ptr.vmem [resolvable:$true] %s310_s16 }
  0x62   : > { %p1966_p3 = scmp.ne.s32.totalorder %s1955_s22, 0  ;;  %p1270_p6 = scmp.lt.u32.totalorder %s1263_s28, %s1909_s4 }
  0x64   : > { %p1266_p8 = pnand %p1264_p11, %p1966_p3 }
  0x66   : > { %p1267_p1 = pneg %p1266_p8 }
  0x68   : > { %p1272_p9 = pnand %p1270_p6, %p1267_p1 }
  0x6a   : > { %1275 = shalt.err (!%p1272_p9)
}
  0x6b   : > { %s1276_s3 = scalar_lea.vmem %s311_s16, 256  ;;  %p1284_p10 = scmp.lt.s32.totalorder %s311_s16, %s311_s16 }
  0x6c   : > { %p1277_p12 = scmp.ne.s32.totalorder %s311_s16, %s1276_s3  ;;  %p1285_p2 = scmp.lt.s32.totalorder %s1276_s3, %s1276_s3 }
  0x6e   : > { %p1279_p13 = pnand %p1277_p12, %p1966_p3  ;;  %p1286_p4 = por %p1285_p2, %p1284_p10 }
  0x70   : > { %p1280_p5 = pneg %p1279_p13 }
  0x72   : > { %p1287_p0 = pnand %p1286_p4, %p1280_p5 }
  0x74   : > { %1290 = shalt.err (!%p1287_p0)
}
  0x75   : > { %s1462_s1 = smov 64   ;;  %s1463_s11 = smov 4  }
  0x76   : > { %p1967_p11 = scmp.ne.s32.totalorder %s1952_s25, 0  ;;  %s1464_s18 = smov [#allocation11]  }
  0x77   : > { %s332_s28 = sshll.u32 %s1464_s18, 4  ;;  %s1707_s10 = scalar_lea.hbm %s1905_s0, %s1639_s29  ;;  %s333_s28 = int_to_ptr.vmem [resolvable:$true] %s332_s28 }
  0x78   : > { %1130 = dma.hbm_to_vmem [thread:$0]  (!%p1967_p11), %s1909_s4, 256, %s311_s16, [#allocation9], %s1462_s1, %s1462_s1, %s1463_s11  }
  0x79   : > { %s1291_s5 = scalar_lea.hbm %s1913_s8, 256 }
  0x7a   : > { %p1292_p0 = scmp.ne.s32.totalorder %s1913_s8, %s1291_s5  ;;  %p1298_p6 = scmp.lt.u32.totalorder %s1291_s5, %s1913_s8 }
  0x7c   : > { %p1294_p8 = pnand %p1292_p0, %p1966_p3 }
  0x7e   : > { %p1295_p1 = pneg %p1294_p8 }
  0x80   : > { %p1300_p9 = pnand %p1298_p6, %p1295_p1 }
  0x82   : > { %1303 = shalt.err (!%p1300_p9)
}
  0x83   : > { %s1304_s13 = scalar_lea.vmem %s333_s28, 256  ;;  %p1312_p10 = scmp.lt.s32.totalorder %s333_s28, %s333_s28 }
  0x84   : > { %p1305_p12 = scmp.ne.s32.totalorder %s333_s28, %s1304_s13  ;;  %p1313_p2 = scmp.lt.s32.totalorder %s1304_s13, %s1304_s13 }
  0x86   : > { %p1307_p13 = pnand %p1305_p12, %p1966_p3  ;;  %p1314_p4 = por %p1313_p2, %p1312_p10 }
  0x88   : > { %p1308_p5 = pneg %p1307_p13 }
  0x8a   : > { %p1315_p7 = pnand %p1314_p4, %p1308_p5 }
  0x8c   : > { %1318 = shalt.err (!%p1315_p7)
}
  0x8d   : > { %1133 = dma.hbm_to_vmem [thread:$0]  (!%p1967_p11), %s1913_s8, 256, %s333_s28, [#allocation12], %s1462_s1, %s1462_s1, %s1463_s11  }
  0x8e   : > { %s353_s5 = scalar_lea.vmem [#allocation2], %s1636_s26  ;;  %s1734_s25 = scalar_lea.hbm %s1907_s2, %s1639_s29 }
  0x8f   : > { %s360_s9 = sshll.u32 %s353_s5, 4  ;;  %s1968_s30 = sand.u32 1, %s1453_s15   ;;  %s1728_s9 = int_to_ptr.vmem [resolvable:$true] %s360_s9 }
  0x90   : > { %s350_s23 = scalar_lea.sflag [#allocation3], %s1968_s30  ;;  %s1319_s3 = scalar_lea.hbm %s1707_s10, 128 }
  0x91   : > { %p1320_p7 = scmp.ne.s32.totalorder %s1707_s10, %s1319_s3  ;;  %p1969_p3 = scmp.ne.s32.totalorder %s1965_s20, 0 }
  0x92   : > { %s1324_s1 = scalar_lea.hbm %s1905_s0, 256  ;;  %p1325_p11 = scmp.lt.u32.totalorder %s1707_s10, %s1905_s0 }
  0x93   : > { %p1322_p0 = pnand %p1320_p7, %p1969_p3  ;;  %p1326_p1 = scmp.lt.u32.totalorder %s1324_s1, %s1319_s3 }
  0x94   : > { %p1328_p9 = scmp.lt.u32.totalorder %s1319_s3, %s1707_s10 }
  0x95   : > { %p1323_p8 = pneg %p1322_p0  ;;  %p1327_p6 = por %p1326_p1, %p1325_p11 }
  0x97   : > { %p1329_p12 = por %p1328_p9, %p1327_p6 }
  0x99   : > { %p1330_p13 = pnand %p1329_p12, %p1323_p8 }
  0x9b   : > { %1333 = shalt.err (!%p1330_p13)
}
  0x9c   : > { %s1334_s29 = scalar_lea.vmem %s1728_s9, 128  ;;  %s1465_s13 = smov [#allocation2]  }
  0x9d   : > { %p1335_p5 = scmp.ne.s32.totalorder %s1728_s9, %s1334_s29  ;;  %s1339_s6 = sshll.u32 %s1465_s13, 4  ;;  %s1340_s6 = int_to_ptr.vmem [resolvable:$false] %s1339_s6 }
  0x9e   : > { %s1341_s7 = scalar_lea.vmem %s1340_s6, 256  ;;  %p1342_p4 = scmp.lt.s32.totalorder %s1728_s9, %s1340_s6 }
  0x9f   : > { %p1337_p10 = pnand %p1335_p5, %p1969_p3  ;;  %p1343_p7 = scmp.lt.s32.totalorder %s1341_s7, %s1334_s29 }
  0xa1   : > { %p1338_p2 = pneg %p1337_p10  ;;  %p1344_p0 = por %p1343_p7, %p1342_p4 }
  0xa3   : > { %p1345_p11 = pnand %p1344_p0, %p1338_p2 }
  0xa5   : > { %1348 = shalt.err (!%p1345_p11)
}
  0xa6   : > { %p1970_p8 = scmp.ne.s32.totalorder %s1963_s27, 0  ;;  %s389_s5 = scalar_lea.vmem [#allocation7], %s1636_s26 }
  0xa7   : > { %s396_s22 = sshll.u32 %s389_s5, 4  ;;  %s1349_s18 = scalar_lea.hbm %s1734_s25, 128  ;;  %s397_s22 = int_to_ptr.vmem [resolvable:$true] %s396_s22 }
  0xa8   : > { %1137 = dma.hbm_to_vmem [thread:$0]  (!%p1970_p8), %s1707_s10, 128, %s1728_s9, %s350_s23  }
  0xa9   : > { %p1350_p1 = scmp.ne.s32.totalorder %s1734_s25, %s1349_s18  ;;  %s1354_s16 = scalar_lea.hbm %s1907_s2, 256 }
  0xaa   : > { %p1355_p12 = scmp.lt.u32.totalorder %s1734_s25, %s1907_s2  ;;  %p1356_p13 = scmp.lt.u32.totalorder %s1354_s16, %s1349_s18 }
  0xab   : > { %p1352_p6 = pnand %p1350_p1, %p1969_p3  ;;  %p1358_p10 = scmp.lt.u32.totalorder %s1349_s18, %s1734_s25 }
  0xac   : > { %p1357_p5 = por %p1356_p13, %p1355_p12 }
  0xad   : > { %p1353_p9 = pneg %p1352_p6 }
  0xae   : > { %p1359_p2 = por %p1358_p10, %p1357_p5 }
  0xb0   : > { %p1360_p4 = pnand %p1359_p2, %p1353_p9 }
  0xb2   : > { %1363 = shalt.err (!%p1360_p4)
}
  0xb3   : > { %s1364_s26 = scalar_lea.vmem %s397_s22, 128  ;;  %s1466_s10 = smov [#allocation7]  }
  0xb4   : > { %p1365_p7 = scmp.ne.s32.totalorder %s397_s22, %s1364_s26  ;;  %s1369_s9 = sshll.u32 %s1466_s10, 4  ;;  %s1370_s9 = int_to_ptr.vmem [resolvable:$false] %s1369_s9 }
  0xb5   : > { %s1371_s23 = scalar_lea.vmem %s1370_s9, 256  ;;  %p1372_p1 = scmp.lt.s32.totalorder %s397_s22, %s1370_s9 }
  0xb6   : > { %p1367_p0 = pnand %p1365_p7, %p1969_p3  ;;  %p1373_p6 = scmp.lt.s32.totalorder %s1371_s23, %s1364_s26 }
  0xb8   : > { %p1368_p11 = pneg %p1367_p0  ;;  %p1374_p8 = por %p1373_p6, %p1372_p1 }
  0xba   : > { %p1375_p12 = pnand %p1374_p8, %p1368_p11 }
  0xbc   : > { %1378 = shalt.err (!%p1375_p12)
}
  0xbd   : > { %p1971_p13 = scmp.ne.s32.totalorder %s1963_s27, 0  ;;  %p1972_p9 = scmp.ne.s32.totalorder %s1950_s21, 0 }
  0xbe   : > { %s1781_s20 = sand.u32 (!%p1972_p9), 1, %s1449_s14   ;;  %p1973_p3 = scmp.ne.s32.totalorder (!%p1972_p9), %s1947_s19, 0 }
  0xbf   : > { %1143 = dma.hbm_to_vmem [thread:$0]  (!%p1971_p13), %s1734_s25, 128, %s397_s22, %s1655_s24  }
  0xc0   : > { %405 = sbr.rel (%p1972_p9) target bundleno = 1420 (0x58c), region = 60  ;;  %s1784_s11 = sshll.u32 (!%p1972_p9), %s1781_s20, 3 }
  0xc1   : > { %s408_s28 = scalar_lea.sflag (!%p1972_p9), [#allocation3], %s1781_s20  ;;  %s411_s29 = scalar_lea.vmem (!%p1972_p9), [#allocation2], %s1784_s11 }
  0xc7   : > { %1424 = dma.done.wait (%p1973_p3), %s408_s28, 128  }
  0xc8   : > { %1426 = vsyncadd (%p1973_p3), %s408_s28, 4294967168  ;;  %s416_s21 = sand.u32 1, %s1546_s17   ;;  %s420_s27 = scalar_lea.vmem [#allocation5], %s1784_s11 }
  0xc9   : > { %s417_s24 = scalar_lea.sflag [#allocation6], %s416_s21 }
  0xca   : > { %1428 = dma.done.wait (%p1973_p3), %s417_s24, 256  }
  0xcb   : > { %1430 = vsyncadd (%p1973_p3), %s417_s24, 4294967040  ;;  %s429_s25 = scalar_lea.vmem [#allocation7], %s1784_s11  ;;  %p1974_p8 = scmp.eq.s32.totalorder %s1546_s17, 0 }
  0xcd   : > { %1432 = dma.done.wait (%p1974_p8), [#allocation9], 384   ;;  %p1975_p5 = pmov %p1974_p8 }
  0xcf   : > { %1434 = vsyncadd (%p1975_p5), [#allocation9], 4294966912  ;;  %p1976_p10 = pmov %p1975_p5 }
  0xd0   : > { %p1977_p2 = pmov %p1975_p5 }
  0xd1   : > { %1436 = dma.done.wait (%p1976_p10), [#allocation12], 256  }
  0xd2   : > { %1438 = vsyncadd (%p1977_p2), [#allocation12], 4294967040  ;;  %v1467_v0 = vmov 0.0   ;;  %vm1468_vm0 = vmmov 0   ;;  %s1978_s6 = sld [smem:[#allocation28_spill]]  ;;  %v1197_v3 = vld [vmem:[#allocation10] sm:$0xff]  }
  0xd3   : > { %1068 = vmatprep.subr.bf16.mxu1 %v1467_v0  ;;  %1060 = vmatprep.subr.bf16.mxu0 %v1467_v0  ;;  %v558_v4 = vld [vmem:[%s420_s27] sm:$0xff]  ;;  %v1198_v5 = vld [vmem:[#allocation10 + $0x8] sm:$0xff]   ;;  %vm514_vm1 = vcmask 261120   ;;  %s1979_s30 = sld [smem:[#allocation29_spill]]  ;;  %s1980_s12 = sld [smem:[#allocation27_spill]]  ;;  %vm721_vm2 = vcmask 64512  }
  0xd4   : > { %1072 = vmatprep.mubr.msk.bf16.mxu1 %vm1468_vm0, %v1467_v0  ;;  %1064 = vmatprep.mubr.msk.bf16.mxu0 %vm1468_vm0, %v1467_v0  ;;  %v489_v6 = vld [vmem:[%s411_s29] sm:$0xff]  ;;  %v559_v7 = vpack.c.bf16 %v558_v4, %v558_v4  ;;  %v674_v26 = vld [vmem:[#allocation8] sm:$0xff]  ;;  %vm737_vm3 = vcmask 1043456   ;;  %s1981_s10 = sld [smem:[#allocation30_spill]]  ;;  %s1982_s9 = sld [smem:[#allocation24_spill]] }
  0xd5   : > { %1061 = vmatpush3.bf16.msra.mxu0 %v1197_v3  ;;  %v490_v8 = vpack.c.bf16 %v489_v6, %v489_v6  ;;  %v626_v24 = vld [vmem:[%s429_s25] sm:$0xff]  ;;  %v1200_v50 = vld [vmem:[#allocation11 + $0x8] sm:$0xff]   ;;  %s1041_s23 = sshll.u32 %s1546_s17, 7  ;;  %s487_s28 = scalar_lea.vmem [#allocation13], %s1784_s11 }
  0xd6   : > { %1062 = vmatprep.subr.bf16.mxu0 %v1467_v0  ;;  %v627_v25 = vpack.c.bf16 %v626_v24, %v626_v24  ;;  %v1199_v45 = vld [vmem:[#allocation11] sm:$0xff]   ;;  %s863_s29 = sshll.u32 %s487_s28, 4  ;;  %s1983_s27 = sld [smem:[#allocation31_spill]]  ;;  %s1862_s29 = int_to_ptr.vmem [resolvable:$true] %s863_s29 }
  0xd7   : > { %s850_s17 = scalar_lea.sflag [#allocation4], %s1781_s20  ;;  %s1379_s11 = scalar_lea.vmem %s1862_s29, 128 }
  0xd8   : > { %v1195_v1 = vld [vmem:[%s1978_s6] sm:$0xff]   ;;  %v1196_v2 = vld [vmem:[%s1978_s6 + $0x8] sm:$0xff]   ;;  %p1380_p4 = scmp.ne.s32.totalorder %s1862_s29, %s1379_s11  ;;  %s1469_s19 = smov [#allocation13]  }
  0xd9   : > { %1069 = vmatpush3.bf16.msra.mxu1 %v1195_v1  ;;  %1063 = vmatpush3.bf16.msra.mxu0 %v1198_v5  ;;  %v1029_v9 = vld [vmem:[%s1979_s30] ss:$0 sm:$0xff]  ;;  %s1383_s13 = sshll.u32 %s1469_s19, 4  ;;  %s1384_s13 = int_to_ptr.vmem [resolvable:$false] %s1383_s13 }
  0xda   : > { %1070 = vmatprep.subr.bf16.mxu1 %v1467_v0  ;;  %1076 = vmatprep.subr.bf16.mxu0 %v1467_v0  ;;  %v1025_v14 = vld [vmem:[%s1980_s12] ss:$0 sm:$0xff]  ;;  %p1984_p7 = scmp.ne.s32.totalorder %s1982_s9, 0  ;;  %s1385_s7 = scalar_lea.vmem %s1384_s13, 256 }
  0xdb   : > { %v1036_v56 = vld [vmem:[%s1981_s10] ss:$0 sm:$0xff]  ;;  %p1386_p1 = scmp.lt.s32.totalorder %s1862_s29, %s1384_s13  ;;  %p1387_p6 = scmp.lt.s32.totalorder %s1385_s7, %s1379_s11 }
  0xdc   : > { %1065 = vmatmul.mubr.msk.bf16.vlgmr.msra.gmra.mrb[0].mxu0 %vm514_vm1, %v490_v8  ;;  %s1860_s25 = scalar_lea.hbm %s1983_s27, %s1041_s23  ;;  %p1381_p0 = pnand %p1380_p4, %p1984_p7 }
  0xdd   : > { %1071 = vmatpush3.bf16.msra.mxu1 %v1196_v2  ;;  %1077 = vmatpush3.bf16.msra.mxu0 %v1195_v1  ;;  %p1388_p12 = por %p1387_p6, %p1386_p1 }
  0xde   : > { %1084 = vmatprep.subr.bf16.mxu1 %v1467_v0  ;;  %1080 = vmatprep.mubr.msk.bf16.mxu0 %vm1468_vm0, %v1467_v0  ;;  %p1382_p11 = pneg %p1381_p0 }
  0xdf   : > { %1078 = vmatprep.subr.bf16.mxu0 %v1467_v0 }
  0xe0   : > { %1073 = vmatmul.mubr.msk.bf16.vlgmr.msra.gmra.mrb[0].mxu1 %vm514_vm1, %v559_v7  ;;  %p1389_p13 = pnand %p1388_p12, %p1382_p11 }
  0xe1   : > { %1086 = vmatprep.mubr.msk.bf16.mxu1 %vm1468_vm0, %v1467_v0  ;;  %1079 = vmatpush3.bf16.msra.mxu0 %v1196_v2 }
  0xe2   : > { %1090 = vmatprep.subr.bf16.mxu0 %v1467_v0 }
  0xe4   : > { %1081 = vmatmul.mubr.msk.bf16.vlgmr.msra.gmra.mrb[4].mxu0 %vm514_vm1, %v627_v25 }
  0xe5   : > { %1092 = vmatprep.mubr.msk.bf16.mxu0 %vm1468_vm0, %v1467_v0 }
 0x1af   : > { %v552_v15 = vpop.f32.mrb[0].mxu0 }
 0x1b0   : > { %v1066_v18 = vpop.f32.mrb[1].mxu0  ;;  %v553_v21 = vadd.f32 %v1025_v14, %v552_v15 }
 0x1b1   : > { %v555_v19 = vpop.f32.mrb[2].mxu0 }
 0x1b2   : > { %v1067_v22 = vpop.f32.mrb[3].mxu0  ;;  %v671_v23 = vpack.c.bf16 %v553_v21, %v553_v21 }
 0x1b3   : > { %v620_v10 = vpop.f32.mrb[0].mxu1 }
 0x1b4   : > { %v621_v11 = vadd.f32 %v1029_v9, %v620_v10  ;;  %v1074_v12 = vpop.f32.mrb[1].mxu1 }
 0x1b5   : > { %v623_v13 = vpop.f32.mrb[2].mxu1 }
 0x1b6   : > { %v672_v16 = vpack.c.bf16 %v621_v11, %v621_v11  ;;  %v1075_v17 = vpop.f32.mrb[3].mxu1 }
 0x1b7   : > { %v665_v38 = vpop.f32.mrb[4].mxu0 }
 0x1b8   : > { %v679_v20 = vsel %vm514_vm1, %v672_v16, 0  ;;  %v1082_v39 = vpop.f32.mrb[5].mxu0  ;;  %v666_v42 = vadd.f32 %v1029_v9, %v665_v38 }
 0x1b9   : > { %1085 = vmatpush3.bf16.xpose.msra.mxu1 %v679_v20  ;;  %v668_v40 = vpop.f32.mrb[6].mxu0 }
 0x1ba   : > { %1096 = vmatprep.subr.bf16.mxu1 %v1467_v0  ;;  %v1083_v41 = vpop.f32.mrb[7].mxu0  ;;  %v673_v43 = vpack.c.bf16 %v666_v42, %v666_v42 }
 0x1bc   : > { %v739_v44 = vsel %vm737_vm3, %v673_v43, 0 }
 0x1bd   : > { %1091 = vmatpush3.bf16.msra.mxu0 %v739_v44 }
 0x1c0   : > { %1087 = vmatmul.mubr.msk.bf16.vlgmr.msra.gmra.mrb[4].mxu1 %vm514_vm1, %v671_v23 }
 0x1c1   : > { %1100 = vmatprep.mubr.msk.bf16.mxu1 %vm1468_vm0, %v1467_v0  ;;  %1097 = vmatpush3.bf16.msra.mxu1 %v1199_v45 }
 0x1c2   : > { %1098 = vmatprep.subr.bf16.mxu1 %v1467_v0 }
 0x1c5   : > { %1099 = vmatpush3.bf16.msra.mxu1 %v1200_v50 }
 0x293   : > { %v715_v27 = vpop.f32.mrb[4].mxu1 }
 0x294   : > { %v716_v28 = vadd.f32 %v715_v27, %v674_v26  ;;  %v1088_v29 = vpop.f32.mrb[5].mxu1 }
 0x295   : > { %v718_v30 = vpop.f32.mrb[6].mxu1 }
 0x296   : > { %v1089_v31 = vpop.f32.mrb[7].mxu1  ;;  %v722_v32 = vsel %vm721_vm2, %v716_v28, -inf }
 0x297   : > { %723 = vmax.xlane.f32.xlu0 %v722_v32 }
 0x324   : > { %v724_v33 = vpop.xlane.xlu0 %723 }
 0x325   : > { %v725_v34 = vsub.f32 %v716_v28, %v724_v33 }
 0x327   : > { %v726_v35 = vmul.f32 1.442695, %v725_v34 }
 0x329   : > { %1201 = vpow2.f32 %v726_v35 }
 0x333   : > { %v1202_v36 = vpop.eup %1201 }
 0x334   : > { %v728_v37 = vsel %vm721_vm2, %v1202_v36, 0.0 }
 0x335   : > { %729 = vadd.xlane.f32.xlu0 %v728_v37 }
 0x3c2   : > { %v730_v46 = vpop.xlane.xlu0 %729 }
 0x3c3   : > { %1203 = vrcp.f32 %v730_v46 }
 0x3cd   : > { %v1204_v47 = vpop.eup %1203 }
 0x3ce   : > { %v732_v48 = vmul.f32 %v1204_v47, %v1202_v36 }
 0x3d0   : > { %v733_v49 = vpack.c.bf16 %v732_v48, %v732_v48 }
 0x3d2   : > { %1093 = vmatmul.mubr.msk.bf16.vlgmr.msra.gmra.mrb[8].mxu0 %vm721_vm2, %v733_v49 }
 0x4a5   : > { %v775_v51 = vpop.f32.mrb[8].mxu0 }
 0x4a6   : > { %v781_v52 = vpack.c.bf16 %v775_v51, %v775_v51  ;;  %v1094_v53 = vpop.f32.mrb[9].mxu0 }
 0x4a7   : > { %v778_v54 = vpop.f32.mrb[10].mxu0 }
 0x4a8   : > { %v1095_v55 = vpop.f32.mrb[11].mxu0  ;;  %1101 = vmatmul.mubr.msk.bf16.vlgmr.msra.gmra.mrb[8].mxu1 %vm514_vm1, %v781_v52 }
 0x57b   : > { %v842_v57 = vpop.f32.mrb[8].mxu1 }
 0x57c   : > { %v843_v58 = vadd.f32 %v1036_v56, %v842_v57  ;;  %v1102_v59 = vpop.f32.mrb[9].mxu1 }
 0x57d   : > { %v845_v60 = vpop.f32.mrb[10].mxu1 }
 0x57e   : > { %v1103_v61 = vpop.f32.mrb[11].mxu1  ;;  %848 = vst.msk [vmem:[%s487_s28] sm:$0xff] %vm514_vm1, %v843_v58 }
 0x57f   : > { %1392 = shalt.err (!%p1389_p13)
}
 0x580   : > { %s1393_s20 = scalar_lea.hbm %s1860_s25, 128  ;;  %s1397_s18 = scalar_lea.hbm %s1983_s27, 256 }
 0x581   : > { %p1394_p9 = scmp.ne.s32.totalorder %s1860_s25, %s1393_s20  ;;  %p1398_p5 = scmp.lt.u32.totalorder %s1860_s25, %s1983_s27 }
 0x582   : > { %p1399_p10 = scmp.lt.u32.totalorder %s1397_s18, %s1393_s20  ;;  %p1401_p4 = scmp.lt.u32.totalorder %s1393_s20, %s1860_s25 }
 0x583   : > { %p1395_p3 = pnand %p1394_p9, %p1984_p7 }
 0x584   : > { %p1400_p2 = por %p1399_p10, %p1398_p5 }
 0x585   : > { %p1396_p8 = pneg %p1395_p3 }
 0x586   : > { %p1402_p0 = por %p1401_p4, %p1400_p2 }
 0x588   : > { %p1403_p11 = pnand %p1402_p0, %p1396_p8 }
 0x58a   : > { %1406 = shalt.err (!%p1403_p11)
}
 0x58b   : > { %1122 = dma.vmem_to_hbm [thread:$0]  (%p1984_p7), %s1862_s29, 128, %s1860_s25, %s850_s17  }
 0x58c PF: > { %s1985_s16 = sld [smem:[#allocation19_spill]]  ;;  %s1986_s12 = sld [smem:[#allocation21_spill]] }
 0x58d   : > { %s1987_s1 = sld [smem:[#allocation20_spill]] }
 0x592   : > { %s875_s26 = sand.u32 1, %s1985_s16   ;;  %p1988_p1 = scmp.ne.s32.totalorder %s1986_s12, 0 }
 0x593   : > { %p1989_p6 = scmp.ge.s32.totalorder %s1987_s1, 2  ;;  %s876_s10 = scalar_lea.sflag [#allocation4], %s875_s26 }
 0x595   : > { %p1145_p12 = pnand %p1989_p6, %p1988_p1 }
 0x597   : > { %1440 = dma.done.wait (!%p1145_p12), %s876_s10, 128  }
 0x598   : > { %1442 = vsyncadd (!%p1145_p12), %s876_s10, 4294967168  ;;  %s1990_s16 = sld [smem:[#allocation22_spill]]  ;;  %s1991_s23 = sld [smem:[#allocation23_spill]] }
 0x599   : > { %s1992_s13 = smov %s1449_s14  ;;  %s1993_s14 = smov %s1453_s15 }
 0x59e   : > { %p28_p13 = scmp.ge.s32.totalorder %s1990_s16, 4   ;;  %s1994_s15 = smov %s1991_s23 }
 0x5a0   :  { %30 = sbr.rel (!%p28_p13) target bundleno = 17 (0x11), region = 141 }
 0x5a7   :  { %881 = vsyncpa [#allocation3], 1 }
 0x5a8   :  { %883 = vsyncpa [#allocation3 + $0x1], 1 }
 0x5a9   :  { %884 = vsyncpa [#allocation6], 1 }
 0x5aa   :  { %886 = vsyncpa [#allocation6 + $0x1], 1 }
 0x5ab   :  { %887 = vsyncpa [#allocation9], 1 }
 0x5ac   :  { %888 = vsyncpa [#allocation12], 1 }
 0x5ad   :  { %889 = vsyncpa [#allocation4], 1 }
 0x5ae   :  { %891 = vsyncpa [#allocation4 + $0x1], 1 }

</bundles_post_ra>
